<compile_context>
chip_gen: v6e
topology: v6e:2x2x1
jax: 0.10.0
libtpu: 0.0.40
codegen_flags: <defaults>
</compile_context>

<pallas_src>
import functools
import math

import jax
import jax.numpy as jnp
from jax import lax
from jax.experimental import pallas as pl
from jax.experimental.pallas import tpu as pltpu

_LANES = 128
_MAX_ROWS_PER_TILE = 256      # 256*128 = 32768 boxes per grid step (~512 KiB/input block)
_EPS = 1e-7
_LOSS_WEIGHT = 1.0


def _fast_recip(x):
    # EUP approximate reciprocal seed + one Newton-Raphson step on the VPU.
    # ~f32-accurate, cheaper than a full f32 divide, and moves the expensive
    # part onto the otherwise idle EUP slot.
    r = pl.reciprocal(x, approx=True)
    return r * (jnp.float32(2.0) - x * r)


def _atan_f32(x):
    # Cephes-style float32 atan (argument reduction + degree-3 poly in x^2).
    # Sign handling via sign-bit extract/reapply; divisions via _fast_recip.
    bits = pltpu.bitcast(x, jnp.uint32)
    sign_bit = bits & jnp.uint32(0x80000000)
    ax = pltpu.bitcast(bits & jnp.uint32(0x7FFFFFFF), jnp.float32)

    tan3pi8 = jnp.float32(2.414213562373095)
    tanpi8 = jnp.float32(0.4142135623730951)
    big = ax > tan3pi8
    mid = jnp.logical_and(ax > tanpi8, jnp.logical_not(big))
    y = jnp.where(big, jnp.float32(math.pi / 2.0),
                  jnp.where(mid, jnp.float32(math.pi / 4.0), jnp.float32(0.0)))
    xr = jnp.where(big, -_fast_recip(ax),
                   jnp.where(mid, (ax - 1.0) * _fast_recip(ax + 1.0), ax))
    z = xr * xr
    poly = ((jnp.float32(8.05374449538e-2) * z - jnp.float32(1.38776856032e-1)) * z
            + jnp.float32(1.99777106478e-1)) * z - jnp.float32(3.33329491539e-1)
    res = y + xr + xr * z * poly
    return pltpu.bitcast(pltpu.bitcast(res, jnp.uint32) | sign_bit, jnp.float32)


def _ciou_loss_kernel(pred_ref, tgt_ref, iou_ref, lpart_ref, *, n, rows_per_tile):
    eps = jnp.float32(_EPS)

    px = pred_ref[0]; py = pred_ref[1]; pw = pred_ref[2]; ph = pred_ref[3]
    tx = tgt_ref[0];  ty = tgt_ref[1];  tw = tgt_ref[2];  th = tgt_ref[3]

    # xywh -> xyxy
    hpw = pw * 0.5; hph = ph * 0.5
    htw = tw * 0.5; hth = th * 0.5
    b1x1 = px - hpw; b1x2 = px + hpw
    b1y1 = py - hph; b1y2 = py + hph
    b2x1 = tx - htw; b2x2 = tx + htw
    b2y1 = ty - hth; b2y2 = ty + hth

    ow = jnp.maximum(jnp.minimum(b1x2, b2x2) - jnp.maximum(b1x1, b2x1), 0.0)
    oh = jnp.maximum(jnp.minimum(b1y2, b2y2) - jnp.maximum(b1y1, b2y1), 0.0)
    overlap = ow * oh
    union = pw * ph + tw * th - overlap + eps
    ious = overlap / union            # kept exact for accuracy

    enc_w = jnp.maximum(jnp.maximum(b1x2, b2x2) - jnp.minimum(b1x1, b2x1), 0.0)
    enc_h = jnp.maximum(jnp.maximum(b1y2, b2y2) - jnp.minimum(b1y1, b2y1), 0.0)
    enclose_area = enc_w * enc_w + enc_h * enc_h + eps

    # ((2tx-2px)^2 + (2ty-2py)^2)/16 == (dx^2 + dy^2) * 0.25
    dx = tx - px
    dy = ty - py
    rho2 = (dx * dx + dy * dy) * jnp.float32(0.25)

    datan = _atan_f32(tw * _fast_recip(th)) - _atan_f32(pw * _fast_recip(ph))
    v = jnp.float32(4.0 / math.pi ** 2) * datan * datan
    alpha = v * _fast_recip(v - ious + jnp.float32(1.0 + _EPS))   # no_grad -> fwd only
    ious = ious - (rho2 * _fast_recip(enclose_area) + alpha * v)
    ious = jnp.clip(ious, -1.0, 1.0)

    iou_ref[...] = ious

    # Lane-dense per-tile loss partial (sum over the sublane axis only).
    # Padding only lives in the last tile, so only that tile pays for the mask.
    i = pl.program_id(0)
    last = pl.num_programs(0) - 1
    loss_elem = 1.0 - ious

    @pl.when(i < last)
    def _full_tile():
        lpart_ref[...] = jnp.sum(loss_elem, axis=0, keepdims=True)

    @pl.when(i == last)
    def _masked_tile():
        base = i * (rows_per_tile * _LANES)
        idx = (base
               + lax.broadcasted_iota(jnp.int32, loss_elem.shape, 0) * _LANES
               + lax.broadcasted_iota(jnp.int32, loss_elem.shape, 1))
        masked = jnp.where(idx < n, loss_elem, 0.0)
        lpart_ref[...] = jnp.sum(masked, axis=0, keepdims=True)


def iou_loss_ciou(pred, target, *, max_rows_per_tile=_MAX_ROWS_PER_TILE):
    """Equivalent of IoULoss().forward(pred, target) with default args.

    pred, target: (n, 4) float32 boxes in xywh format.
    Returns (loss_scalar, iou_vector_of_shape_(n,)).
    """
    # TODO(synk): element-wise `weight`, `avg_factor` and `reduction_override`
    # of the PyTorch module are not exposed (defaults None / 'mean' only).
    n = pred.shape[0]
    if n == 0:
        # torch: mean over an empty tensor is NaN.
        return jnp.float32(jnp.nan), jnp.zeros((0,), jnp.float32)

    rows = pl.cdiv(n, _LANES)
    rows_per_tile = max(8, min(int(max_rows_per_tile), 8 * pl.cdiv(rows, 8)))
    num_tiles = pl.cdiv(rows, rows_per_tile)
    rows_pad = num_tiles * rows_per_tile
    n_pad = rows_pad * _LANES

    # Single fused pad+transpose per input; pad with unit boxes (1,1,1,1) so
    # padded lanes stay finite (no 0/0 NaNs).  They are masked out of the loss
    # and sliced off the returned iou.
    pred_t = jnp.pad(pred.astype(jnp.float32).T, ((0, 0), (0, n_pad - n)),
                     constant_values=1.0).reshape(4, rows_pad, _LANES)
    tgt_t = jnp.pad(target.astype(jnp.float32).T, ((0, 0), (0, n_pad - n)),
                    constant_values=1.0).reshape(4, rows_pad, _LANES)

    kernel = functools.partial(_ciou_loss_kernel, n=n, rows_per_tile=rows_per_tile)

    iou_pad, loss_parts = pl.pallas_call(
        kernel,
        out_shape=(jax.ShapeDtypeStruct((rows_pad, _LANES), jnp.float32),
                   jax.ShapeDtypeStruct((num_tiles, _LANES), jnp.float32)),
        grid=(num_tiles,),
        in_specs=[
            pl.BlockSpec((4, rows_per_tile, _LANES), lambda i: (0, i, 0)),
            pl.BlockSpec((4, rows_per_tile, _LANES), lambda i: (0, i, 0)),
        ],
        out_specs=(
            pl.BlockSpec((rows_per_tile, _LANES), lambda i: (i, 0)),
            pl.BlockSpec((1, _LANES), lambda i: (i, 0)),
        ),
        compiler_params=pltpu.CompilerParams(
            dimension_semantics=("parallel",)),
    )(pred_t, tgt_t)

    inv_n = jnp.float32(_LOSS_WEIGHT / n)        # n is static -> free scalar
    loss = inv_n * jnp.sum(loss_parts)
    return loss, iou_pad.reshape(-1)[:n]


def _reference_ciou_loss(pred, target, eps=1e-7):
    # Pure-JAX transcription of the PyTorch bbox_overlaps / IoULoss defaults.
    p = jnp.concatenate((pred[..., :2] - pred[..., 2:] / 2,
                         pred[..., :2] + pred[..., 2:] / 2), axis=-1)
    t = jnp.concatenate((target[..., :2] - target[..., 2:] / 2,
                         target[..., :2] + target[..., 2:] / 2), axis=-1)
    b1x1, b1y1, b1x2, b1y2 = p[..., 0], p[..., 1], p[..., 2], p[..., 3]
    b2x1, b2y1, b2x2, b2y2 = t[..., 0], t[..., 1], t[..., 2], t[..., 3]
    overlap = (jnp.clip(jnp.minimum(b1x2, b2x2) - jnp.maximum(b1x1, b2x1), 0)
               * jnp.clip(jnp.minimum(b1y2, b2y2) - jnp.maximum(b1y1, b2y1), 0))
    w1, h1 = b1x2 - b1x1, b1y2 - b1y1
    w2, h2 = b2x2 - b2x1, b2y2 - b2y1
    union = w1 * h1 + w2 * h2 - overlap + eps
    ious = overlap / union
    enc_w = jnp.clip(jnp.maximum(b1x2, b2x2) - jnp.minimum(b1x1, b2x1), 0)
    enc_h = jnp.clip(jnp.maximum(b1y2, b2y2) - jnp.minimum(b1y1, b2y1), 0)
    enclose_area = enc_w ** 2 + enc_h ** 2 + eps
    rho2 = ((b2x1 + b2x2 - b1x1 - b1x2) ** 2
            + (b2y1 + b2y2 - b1y1 - b1y2) ** 2) / 16
    v = 4 / math.pi ** 2 * (jnp.arctan(w2 / h2) - jnp.arctan(w1 / h1)) ** 2
    alpha = v / (v - ious + (1 + eps))
    ious = jnp.clip(ious - (rho2 / enclose_area + alpha * v), -1.0, 1.0)
    return jnp.mean(1.0 - ious), ious


if __name__ == "__main__":
    key = jax.random.PRNGKey(0)

    def make_boxes(k, n):
        ka, kb = jax.random.split(k)
        return jnp.concatenate(
            [jax.random.uniform(ka, (n, 2), jnp.float32) * 10.0,
             jax.random.uniform(kb, (n, 2), jnp.float32) * 4.0 + 1.0], axis=-1)

    # (n, 4) boxes, as in IoULoss.forward's documented shape.
    # Second case forces the multi-tile path + last-tile masking.
    for n, max_rows in ((16, _MAX_ROWS_PER_TILE), (3000, 8)):
        kp, kt = jax.random.split(jax.random.fold_in(key, n))
        pred = make_boxes(kp, n)
        target = make_boxes(kt, n)

        loss, iou = iou_loss_ciou(pred, target, max_rows_per_tile=max_rows)
        jax.block_until_ready((loss, iou))

        ref_loss, ref_iou = _reference_ciou_loss(pred, target)
        assert jnp.allclose(iou, ref_iou, atol=1e-4, rtol=1e-4), (n, iou, ref_iou)
        assert jnp.allclose(loss, ref_loss, atol=1e-4, rtol=1e-4), (n, loss, ref_loss)

    print("KERNEL_OK")
</pallas_src>

<mosaic_0001>
module attributes {stable_mosaic.version = 11 : i64} {
  func.func @_ciou_loss_kernel(%arg0: i32, %arg1: memref<4x8x128xf32, #tpu.memory_space<vmem>>, %arg2: memref<4x8x128xf32, #tpu.memory_space<vmem>>, %arg3: memref<8x128xf32, #tpu.memory_space<vmem>>, %arg4: memref<1x128xf32, #tpu.memory_space<vmem>>) attributes {dimension_semantics = [#tpu.dimension_semantics<parallel>], iteration_bounds = array<i64: 1>, scalar_prefetch = 0 : i64, scratch_operands = 0 : i64, tpu.core_type = #tpu.core_type<tc>, window_params = [{transform_indices = @transform_0, window_bounds = array<i64: 4, 8, 128>}, {transform_indices = @transform_1, window_bounds = array<i64: 4, 8, 128>}, {transform_indices = @transform_2, window_bounds = array<i64: 8, 128>}, {transform_indices = @transform_3, window_bounds = array<i64: 1, 128>}]} {
    %c0 = arith.constant 0 : index
    %c0_0 = arith.constant 0 : index
    %c0_1 = arith.constant 0 : index
    %0 = vector.load %arg1[%c0, %c0_0, %c0_1] : memref<4x8x128xf32, #tpu.memory_space<vmem>>, vector<1x8x128xf32>
    %1 = vector.shape_cast %0 : vector<1x8x128xf32> to vector<8x128xf32>
    %c1 = arith.constant 1 : index
    %c0_2 = arith.constant 0 : index
    %c0_3 = arith.constant 0 : index
    %2 = vector.load %arg1[%c1, %c0_2, %c0_3] : memref<4x8x128xf32, #tpu.memory_space<vmem>>, vector<1x8x128xf32>
    %3 = vector.shape_cast %2 : vector<1x8x128xf32> to vector<8x128xf32>
    %c2 = arith.constant 2 : index
    %c0_4 = arith.constant 0 : index
    %c0_5 = arith.constant 0 : index
    %4 = vector.load %arg1[%c2, %c0_4, %c0_5] : memref<4x8x128xf32, #tpu.memory_space<vmem>>, vector<1x8x128xf32>
    %5 = vector.shape_cast %4 : vector<1x8x128xf32> to vector<8x128xf32>
    %c3 = arith.constant 3 : index
    %c0_6 = arith.constant 0 : index
    %c0_7 = arith.constant 0 : index
    %6 = vector.load %arg1[%c3, %c0_6, %c0_7] : memref<4x8x128xf32, #tpu.memory_space<vmem>>, vector<1x8x128xf32>
    %7 = vector.shape_cast %6 : vector<1x8x128xf32> to vector<8x128xf32>
    %c0_8 = arith.constant 0 : index
    %c0_9 = arith.constant 0 : index
    %c0_10 = arith.constant 0 : index
    %8 = vector.load %arg2[%c0_8, %c0_9, %c0_10] : memref<4x8x128xf32, #tpu.memory_space<vmem>>, vector<1x8x128xf32>
    %9 = vector.shape_cast %8 : vector<1x8x128xf32> to vector<8x128xf32>
    %c1_11 = arith.constant 1 : index
    %c0_12 = arith.constant 0 : index
    %c0_13 = arith.constant 0 : index
    %10 = vector.load %arg2[%c1_11, %c0_12, %c0_13] : memref<4x8x128xf32, #tpu.memory_space<vmem>>, vector<1x8x128xf32>
    %11 = vector.shape_cast %10 : vector<1x8x128xf32> to vector<8x128xf32>
    %c2_14 = arith.constant 2 : index
    %c0_15 = arith.constant 0 : index
    %c0_16 = arith.constant 0 : index
    %12 = vector.load %arg2[%c2_14, %c0_15, %c0_16] : memref<4x8x128xf32, #tpu.memory_space<vmem>>, vector<1x8x128xf32>
    %13 = vector.shape_cast %12 : vector<1x8x128xf32> to vector<8x128xf32>
    %c3_17 = arith.constant 3 : index
    %c0_18 = arith.constant 0 : index
    %c0_19 = arith.constant 0 : index
    %14 = vector.load %arg2[%c3_17, %c0_18, %c0_19] : memref<4x8x128xf32, #tpu.memory_space<vmem>>, vector<1x8x128xf32>
    %15 = vector.shape_cast %14 : vector<1x8x128xf32> to vector<8x128xf32>
    %cst = arith.constant 5.000000e-01 : f32
    %16 = vector.broadcast %cst : f32 to vector<8x128xf32>
    %17 = arith.mulf %5, %16 : vector<8x128xf32>
    %cst_20 = arith.constant 5.000000e-01 : f32
    %18 = vector.broadcast %cst_20 : f32 to vector<8x128xf32>
    %19 = arith.mulf %7, %18 : vector<8x128xf32>
    %cst_21 = arith.constant 5.000000e-01 : f32
    %20 = vector.broadcast %cst_21 : f32 to vector<8x128xf32>
    %21 = arith.mulf %13, %20 : vector<8x128xf32>
    %cst_22 = arith.constant 5.000000e-01 : f32
    %22 = vector.broadcast %cst_22 : f32 to vector<8x128xf32>
    %23 = arith.mulf %15, %22 : vector<8x128xf32>
    %24 = arith.subf %1, %17 : vector<8x128xf32>
    %25 = arith.addf %1, %17 : vector<8x128xf32>
    %26 = arith.subf %3, %19 : vector<8x128xf32>
    %27 = arith.addf %3, %19 : vector<8x128xf32>
    %28 = arith.subf %9, %21 : vector<8x128xf32>
    %29 = arith.addf %9, %21 : vector<8x128xf32>
    %30 = arith.subf %11, %23 : vector<8x128xf32>
    %31 = arith.addf %11, %23 : vector<8x128xf32>
    %32 = arith.minimumf %25, %29 : vector<8x128xf32>
    %33 = arith.maximumf %24, %28 : vector<8x128xf32>
    %34 = arith.subf %32, %33 : vector<8x128xf32>
    %cst_23 = arith.constant 0.000000e+00 : f32
    %35 = vector.broadcast %cst_23 : f32 to vector<8x128xf32>
    %36 = arith.maximumf %34, %35 : vector<8x128xf32>
    %37 = arith.minimumf %27, %31 : vector<8x128xf32>
    %38 = arith.maximumf %26, %30 : vector<8x128xf32>
    %39 = arith.subf %37, %38 : vector<8x128xf32>
    %cst_24 = arith.constant 0.000000e+00 : f32
    %40 = vector.broadcast %cst_24 : f32 to vector<8x128xf32>
    %41 = arith.maximumf %39, %40 : vector<8x128xf32>
    %42 = arith.mulf %36, %41 : vector<8x128xf32>
    %43 = arith.mulf %5, %7 : vector<8x128xf32>
    %44 = arith.mulf %13, %15 : vector<8x128xf32>
    %45 = arith.addf %43, %44 : vector<8x128xf32>
    %46 = arith.subf %45, %42 : vector<8x128xf32>
    %cst_25 = arith.constant 1.000000e-07 : f32
    %47 = vector.broadcast %cst_25 : f32 to vector<8x128xf32>
    %48 = arith.addf %46, %47 : vector<8x128xf32>
    %49 = arith.divf %42, %48 : vector<8x128xf32>
    %50 = arith.maximumf %25, %29 : vector<8x128xf32>
    %51 = arith.minimumf %24, %28 : vector<8x128xf32>
    %52 = arith.subf %50, %51 : vector<8x128xf32>
    %cst_26 = arith.constant 0.000000e+00 : f32
    %53 = vector.broadcast %cst_26 : f32 to vector<8x128xf32>
    %54 = arith.maximumf %52, %53 : vector<8x128xf32>
    %55 = arith.maximumf %27, %31 : vector<8x128xf32>
    %56 = arith.minimumf %26, %30 : vector<8x128xf32>
    %57 = arith.subf %55, %56 : vector<8x128xf32>
    %cst_27 = arith.constant 0.000000e+00 : f32
    %58 = vector.broadcast %cst_27 : f32 to vector<8x128xf32>
    %59 = arith.maximumf %57, %58 : vector<8x128xf32>
    %60 = arith.mulf %54, %54 : vector<8x128xf32>
    %61 = arith.mulf %59, %59 : vector<8x128xf32>
    %62 = arith.addf %60, %61 : vector<8x128xf32>
    %cst_28 = arith.constant 1.000000e-07 : f32
    %63 = vector.broadcast %cst_28 : f32 to vector<8x128xf32>
    %64 = arith.addf %62, %63 : vector<8x128xf32>
    %65 = arith.subf %9, %1 : vector<8x128xf32>
    %66 = arith.subf %11, %3 : vector<8x128xf32>
    %67 = arith.mulf %65, %65 : vector<8x128xf32>
    %68 = arith.mulf %66, %66 : vector<8x128xf32>
    %69 = arith.addf %67, %68 : vector<8x128xf32>
    %cst_29 = arith.constant 2.500000e-01 : f32
    %70 = vector.broadcast %cst_29 : f32 to vector<8x128xf32>
    %71 = arith.mulf %69, %70 : vector<8x128xf32>
    %72 = tpu.reciprocal %15 {approx = true} : vector<8x128xf32> -> vector<8x128xf32>
    %73 = arith.mulf %15, %72 : vector<8x128xf32>
    %cst_30 = arith.constant 2.000000e+00 : f32
    %74 = vector.broadcast %cst_30 : f32 to vector<8x128xf32>
    %75 = arith.subf %74, %73 : vector<8x128xf32>
    %76 = arith.mulf %72, %75 : vector<8x128xf32>
    %77 = arith.mulf %13, %76 : vector<8x128xf32>
    %78 = tpu.bitcast %77 : vector<8x128xf32> -> vector<8x128xi32>
    %c-2147483648_i32 = arith.constant -2147483648 : i32
    %79 = vector.broadcast %c-2147483648_i32 : i32 to vector<8x128xi32>
    %80 = arith.andi %78, %79 : vector<8x128xi32>
    %c2147483647_i32 = arith.constant 2147483647 : i32
    %81 = vector.broadcast %c2147483647_i32 : i32 to vector<8x128xi32>
    %82 = arith.andi %78, %81 : vector<8x128xi32>
    %83 = tpu.bitcast %82 : vector<8x128xi32> -> vector<8x128xf32>
    %cst_31 = arith.constant 2.41421366 : f32
    %84 = vector.broadcast %cst_31 : f32 to vector<8x128xf32>
    %85 = arith.cmpf ogt, %83, %84 : vector<8x128xf32>
    %cst_32 = arith.constant 0.414213568 : f32
    %86 = vector.broadcast %cst_32 : f32 to vector<8x128xf32>
    %87 = arith.cmpf ogt, %83, %86 : vector<8x128xf32>
    %cst_33 = arith.constant dense<true> : vector<8x128xi1>
    %88 = arith.xori %85, %cst_33 : vector<8x128xi1>
    %89 = arith.andi %87, %88 : vector<8x128xi1>
    %cst_34 = arith.constant 0.785398185 : f32
    %cst_35 = arith.constant 0.000000e+00 : f32
    %90 = vector.broadcast %cst_34 : f32 to vector<8x128xf32>
    %91 = vector.broadcast %cst_35 : f32 to vector<8x128xf32>
    %92 = arith.select %89, %90, %91 : vector<8x128xi1>, vector<8x128xf32>
    %cst_36 = arith.constant 1.57079637 : f32
    %93 = vector.broadcast %cst_36 : f32 to vector<8x128xf32>
    %94 = arith.select %85, %93, %92 : vector<8x128xi1>, vector<8x128xf32>
    %95 = tpu.reciprocal %83 {approx = true} : vector<8x128xf32> -> vector<8x128xf32>
    %96 = arith.mulf %83, %95 : vector<8x128xf32>
    %cst_37 = arith.constant 2.000000e+00 : f32
    %97 = vector.broadcast %cst_37 : f32 to vector<8x128xf32>
    %98 = arith.subf %97, %96 : vector<8x128xf32>
    %99 = arith.mulf %95, %98 : vector<8x128xf32>
    %cst_38 = arith.constant 0.000000e+00 : f32
    %100 = vector.broadcast %cst_38 : f32 to vector<8x128xf32>
    %101 = arith.subf %100, %99 : vector<8x128xf32>
    %cst_39 = arith.constant 1.000000e+00 : f32
    %102 = vector.broadcast %cst_39 : f32 to vector<8x128xf32>
    %103 = arith.subf %83, %102 : vector<8x128xf32>
    %cst_40 = arith.constant 1.000000e+00 : f32
    %104 = vector.broadcast %cst_40 : f32 to vector<8x128xf32>
    %105 = arith.addf %83, %104 : vector<8x128xf32>
    %106 = tpu.reciprocal %105 {approx = true} : vector<8x128xf32> -> vector<8x128xf32>
    %107 = arith.mulf %105, %106 : vector<8x128xf32>
    %cst_41 = arith.constant 2.000000e+00 : f32
    %108 = vector.broadcast %cst_41 : f32 to vector<8x128xf32>
    %109 = arith.subf %108, %107 : vector<8x128xf32>
    %110 = arith.mulf %106, %109 : vector<8x128xf32>
    %111 = arith.mulf %103, %110 : vector<8x128xf32>
    %112 = arith.select %89, %111, %83 : vector<8x128xi1>, vector<8x128xf32>
    %113 = arith.select %85, %101, %112 : vector<8x128xi1>, vector<8x128xf32>
    %114 = arith.mulf %113, %113 : vector<8x128xf32>
    %cst_42 = arith.constant 0.0805374458 : f32
    %115 = vector.broadcast %cst_42 : f32 to vector<8x128xf32>
    %116 = arith.mulf %115, %114 : vector<8x128xf32>
    %cst_43 = arith.constant 0.138776854 : f32
    %117 = vector.broadcast %cst_43 : f32 to vector<8x128xf32>
    %118 = arith.subf %116, %117 : vector<8x128xf32>
    %119 = arith.mulf %118, %114 : vector<8x128xf32>
    %cst_44 = arith.constant 0.199777111 : f32
    %120 = vector.broadcast %cst_44 : f32 to vector<8x128xf32>
    %121 = arith.addf %119, %120 : vector<8x128xf32>
    %122 = arith.mulf %121, %114 : vector<8x128xf32>
    %cst_45 = arith.constant 0.333329499 : f32
    %123 = vector.broadcast %cst_45 : f32 to vector<8x128xf32>
    %124 = arith.subf %122, %123 : vector<8x128xf32>
    %125 = arith.addf %94, %113 : vector<8x128xf32>
    %126 = arith.mulf %113, %114 : vector<8x128xf32>
    %127 = arith.mulf %126, %124 : vector<8x128xf32>
    %128 = arith.addf %125, %127 : vector<8x128xf32>
    %129 = tpu.bitcast %128 : vector<8x128xf32> -> vector<8x128xi32>
    %130 = arith.ori %129, %80 : vector<8x128xi32>
    %131 = tpu.bitcast %130 : vector<8x128xi32> -> vector<8x128xf32>
    %132 = tpu.reciprocal %7 {approx = true} : vector<8x128xf32> -> vector<8x128xf32>
    %133 = arith.mulf %7, %132 : vector<8x128xf32>
    %cst_46 = arith.constant 2.000000e+00 : f32
    %134 = vector.broadcast %cst_46 : f32 to vector<8x128xf32>
    %135 = arith.subf %134, %133 : vector<8x128xf32>
    %136 = arith.mulf %132, %135 : vector<8x128xf32>
    %137 = arith.mulf %5, %136 : vector<8x128xf32>
    %138 = tpu.bitcast %137 : vector<8x128xf32> -> vector<8x128xi32>
    %c-2147483648_i32_47 = arith.constant -2147483648 : i32
    %139 = vector.broadcast %c-2147483648_i32_47 : i32 to vector<8x128xi32>
    %140 = arith.andi %138, %139 : vector<8x128xi32>
    %c2147483647_i32_48 = arith.constant 2147483647 : i32
    %141 = vector.broadcast %c2147483647_i32_48 : i32 to vector<8x128xi32>
    %142 = arith.andi %138, %141 : vector<8x128xi32>
    %143 = tpu.bitcast %142 : vector<8x128xi32> -> vector<8x128xf32>
    %cst_49 = arith.constant 2.41421366 : f32
    %144 = vector.broadcast %cst_49 : f32 to vector<8x128xf32>
    %145 = arith.cmpf ogt, %143, %144 : vector<8x128xf32>
    %cst_50 = arith.constant 0.414213568 : f32
    %146 = vector.broadcast %cst_50 : f32 to vector<8x128xf32>
    %147 = arith.cmpf ogt, %143, %146 : vector<8x128xf32>
    %cst_51 = arith.constant dense<true> : vector<8x128xi1>
    %148 = arith.xori %145, %cst_51 : vector<8x128xi1>
    %149 = arith.andi %147, %148 : vector<8x128xi1>
    %cst_52 = arith.constant 0.785398185 : f32
    %cst_53 = arith.constant 0.000000e+00 : f32
    %150 = vector.broadcast %cst_52 : f32 to vector<8x128xf32>
    %151 = vector.broadcast %cst_53 : f32 to vector<8x128xf32>
    %152 = arith.select %149, %150, %151 : vector<8x128xi1>, vector<8x128xf32>
    %cst_54 = arith.constant 1.57079637 : f32
    %153 = vector.broadcast %cst_54 : f32 to vector<8x128xf32>
    %154 = arith.select %145, %153, %152 : vector<8x128xi1>, vector<8x128xf32>
    %155 = tpu.reciprocal %143 {approx = true} : vector<8x128xf32> -> vector<8x128xf32>
    %156 = arith.mulf %143, %155 : vector<8x128xf32>
    %cst_55 = arith.constant 2.000000e+00 : f32
    %157 = vector.broadcast %cst_55 : f32 to vector<8x128xf32>
    %158 = arith.subf %157, %156 : vector<8x128xf32>
    %159 = arith.mulf %155, %158 : vector<8x128xf32>
    %cst_56 = arith.constant 0.000000e+00 : f32
    %160 = vector.broadcast %cst_56 : f32 to vector<8x128xf32>
    %161 = arith.subf %160, %159 : vector<8x128xf32>
    %cst_57 = arith.constant 1.000000e+00 : f32
    %162 = vector.broadcast %cst_57 : f32 to vector<8x128xf32>
    %163 = arith.subf %143, %162 : vector<8x128xf32>
    %cst_58 = arith.constant 1.000000e+00 : f32
    %164 = vector.broadcast %cst_58 : f32 to vector<8x128xf32>
    %165 = arith.addf %143, %164 : vector<8x128xf32>
    %166 = tpu.reciprocal %165 {approx = true} : vector<8x128xf32> -> vector<8x128xf32>
    %167 = arith.mulf %165, %166 : vector<8x128xf32>
    %cst_59 = arith.constant 2.000000e+00 : f32
    %168 = vector.broadcast %cst_59 : f32 to vector<8x128xf32>
    %169 = arith.subf %168, %167 : vector<8x128xf32>
    %170 = arith.mulf %166, %169 : vector<8x128xf32>
    %171 = arith.mulf %163, %170 : vector<8x128xf32>
    %172 = arith.select %149, %171, %143 : vector<8x128xi1>, vector<8x128xf32>
    %173 = arith.select %145, %161, %172 : vector<8x128xi1>, vector<8x128xf32>
    %174 = arith.mulf %173, %173 : vector<8x128xf32>
    %cst_60 = arith.constant 0.0805374458 : f32
    %175 = vector.broadcast %cst_60 : f32 to vector<8x128xf32>
    %176 = arith.mulf %175, %174 : vector<8x128xf32>
    %cst_61 = arith.constant 0.138776854 : f32
    %177 = vector.broadcast %cst_61 : f32 to vector<8x128xf32>
    %178 = arith.subf %176, %177 : vector<8x128xf32>
    %179 = arith.mulf %178, %174 : vector<8x128xf32>
    %cst_62 = arith.constant 0.199777111 : f32
    %180 = vector.broadcast %cst_62 : f32 to vector<8x128xf32>
    %181 = arith.addf %179, %180 : vector<8x128xf32>
    %182 = arith.mulf %181, %174 : vector<8x128xf32>
    %cst_63 = arith.constant 0.333329499 : f32
    %183 = vector.broadcast %cst_63 : f32 to vector<8x128xf32>
    %184 = arith.subf %182, %183 : vector<8x128xf32>
    %185 = arith.addf %154, %173 : vector<8x128xf32>
    %186 = arith.mulf %173, %174 : vector<8x128xf32>
    %187 = arith.mulf %186, %184 : vector<8x128xf32>
    %188 = arith.addf %185, %187 : vector<8x128xf32>
    %189 = tpu.bitcast %188 : vector<8x128xf32> -> vector<8x128xi32>
    %190 = arith.ori %189, %140 : vector<8x128xi32>
    %191 = tpu.bitcast %190 : vector<8x128xi32> -> vector<8x128xf32>
    %192 = arith.subf %131, %191 : vector<8x128xf32>
    %cst_64 = arith.constant 0.405284733 : f32
    %193 = vector.broadcast %cst_64 : f32 to vector<8x128xf32>
    %194 = arith.mulf %193, %192 : vector<8x128xf32>
    %195 = arith.mulf %194, %192 : vector<8x128xf32>
    %196 = arith.subf %195, %49 : vector<8x128xf32>
    %cst_65 = arith.constant 1.00000012 : f32
    %197 = vector.broadcast %cst_65 : f32 to vector<8x128xf32>
    %198 = arith.addf %196, %197 : vector<8x128xf32>
    %199 = tpu.reciprocal %198 {approx = true} : vector<8x128xf32> -> vector<8x128xf32>
    %200 = arith.mulf %198, %199 : vector<8x128xf32>
    %cst_66 = arith.constant 2.000000e+00 : f32
    %201 = vector.broadcast %cst_66 : f32 to vector<8x128xf32>
    %202 = arith.subf %201, %200 : vector<8x128xf32>
    %203 = arith.mulf %199, %202 : vector<8x128xf32>
    %204 = arith.mulf %195, %203 : vector<8x128xf32>
    %205 = tpu.reciprocal %64 {approx = true} : vector<8x128xf32> -> vector<8x128xf32>
    %206 = arith.mulf %64, %205 : vector<8x128xf32>
    %cst_67 = arith.constant 2.000000e+00 : f32
    %207 = vector.broadcast %cst_67 : f32 to vector<8x128xf32>
    %208 = arith.subf %207, %206 : vector<8x128xf32>
    %209 = arith.mulf %205, %208 : vector<8x128xf32>
    %210 = arith.mulf %71, %209 : vector<8x128xf32>
    %211 = arith.mulf %204, %195 : vector<8x128xf32>
    %212 = arith.addf %210, %211 : vector<8x128xf32>
    %213 = arith.subf %49, %212 : vector<8x128xf32>
    %cst_68 = arith.constant -1.000000e+00 : f32
    %cst_69 = arith.constant 1.000000e+00 : f32
    %214 = vector.broadcast %cst_68 : f32 to vector<8x128xf32>
    %215 = arith.maximumf %214, %213 : vector<8x128xf32>
    %216 = vector.broadcast %cst_69 : f32 to vector<8x128xf32>
    %217 = arith.minimumf %216, %215 : vector<8x128xf32>
    %c0_70 = arith.constant 0 : index
    %c0_71 = arith.constant 0 : index
    %218 = vector.load %arg3[%c0_70, %c0_71] : memref<8x128xf32, #tpu.memory_space<vmem>>, vector<8x128xf32>
    tpu.vector_store %arg3[%c0_70, %c0_71], %217 {strides = array<i32>} : memref<8x128xf32, #tpu.memory_space<vmem>>, vector<8x128xf32>,
    %cst_72 = arith.constant 1.000000e+00 : f32
    %219 = vector.broadcast %cst_72 : f32 to vector<8x128xf32>
    %220 = arith.subf %219, %217 : vector<8x128xf32>
    %c0_i32 = arith.constant 0 : i32
    %221 = arith.cmpi slt, %arg0, %c0_i32 : i32
    %222 = arith.extui %221 : i1 to i32
    %c0_i32_73 = arith.constant 0 : i32
    %223 = arith.cmpi ne, %222, %c0_i32_73 : i32
    scf.if %223 {
      %cst_76 = arith.constant dense<0.000000e+00> : vector<128xf32>
      %227 = vector.multi_reduction <add>, %220, %cst_76 [0] : vector<8x128xf32> to vector<128xf32>
      %228 = vector.shape_cast %227 : vector<128xf32> to vector<1x128xf32>
      %c0_77 = arith.constant 0 : index
      %c0_78 = arith.constant 0 : index
      %229 = vector.load %arg4[%c0_77, %c0_78] : memref<1x128xf32, #tpu.memory_space<vmem>>, vector<1x128xf32>
      tpu.vector_store %arg4[%c0_77, %c0_78], %228 {strides = array<i32>} : memref<1x128xf32, #tpu.memory_space<vmem>>, vector<1x128xf32>,
    } else {
    }
    %c0_i32_74 = arith.constant 0 : i32
    %224 = arith.cmpi eq, %arg0, %c0_i32_74 : i32
    %225 = arith.extui %224 : i1 to i32
    %c0_i32_75 = arith.constant 0 : i32
    %226 = arith.cmpi ne, %225, %c0_i32_75 : i32
    scf.if %226 {
      %c1024_i32 = arith.constant 1024 : i32
      %227 = arith.muli %arg0, %c1024_i32 : i32
      %228 = tpu.iota {dimensions = array<i32: 0>} : vector<8x128xi32>
      %c128_i32 = arith.constant 128 : i32
      %229 = vector.broadcast %c128_i32 : i32 to vector<8x128xi32>
      %230 = arith.muli %228, %229 : vector<8x128xi32>
      %231 = vector.broadcast %227 : i32 to vector<8x128xi32>
      %232 = arith.addi %231, %230 : vector<8x128xi32>
      %233 = tpu.iota {dimensions = array<i32: 1>} : vector<8x128xi32>
      %234 = arith.addi %232, %233 : vector<8x128xi32>
      %c16_i32 = arith.constant 16 : i32
      %235 = vector.broadcast %c16_i32 : i32 to vector<8x128xi32>
      %236 = arith.cmpi slt, %234, %235 : vector<8x128xi32>
      %cst_76 = arith.constant 0.000000e+00 : f32
      %237 = vector.broadcast %cst_76 : f32 to vector<8x128xf32>
      %238 = arith.select %236, %220, %237 : vector<8x128xi1>, vector<8x128xf32>
      %cst_77 = arith.constant dense<0.000000e+00> : vector<128xf32>
      %239 = vector.multi_reduction <add>, %238, %cst_77 [0] : vector<8x128xf32> to vector<128xf32>
      %240 = vector.shape_cast %239 : vector<128xf32> to vector<1x128xf32>
      %c0_78 = arith.constant 0 : index
      %c0_79 = arith.constant 0 : index
      %241 = vector.load %arg4[%c0_78, %c0_79] : memref<1x128xf32, #tpu.memory_space<vmem>>, vector<1x128xf32>
      tpu.vector_store %arg4[%c0_78, %c0_79], %240 {strides = array<i32>} : memref<1x128xf32, #tpu.memory_space<vmem>>, vector<1x128xf32>,
    } else {
    }
    return
  }
  func.func @transform_0(%arg0: i32) -> (i32, i32, i32) {
    %c0_i32 = arith.constant 0 : i32
    %c0_i32_0 = arith.constant 0 : i32
    %c0_i32_1 = arith.constant 0 : i32
    return %c0_i32, %arg0, %c0_i32_0 : i32, i32, i32
  }
  func.func @transform_1(%arg0: i32) -> (i32, i32, i32) {
    %c0_i32 = arith.constant 0 : i32
    %c0_i32_0 = arith.constant 0 : i32
    %c0_i32_1 = arith.constant 0 : i32
    return %c0_i32, %arg0, %c0_i32_0 : i32, i32, i32
  }
  func.func @transform_2(%arg0: i32) -> (i32, i32) {
    %c0_i32 = arith.constant 0 : i32
    %c0_i32_0 = arith.constant 0 : i32
    return %arg0, %c0_i32 : i32, i32
  }
  func.func @transform_3(%arg0: i32) -> (i32, i32) {
    %c0_i32 = arith.constant 0 : i32
    %c0_i32_0 = arith.constant 0 : i32
    return %arg0, %c0_i32 : i32, i32
  }
}

</mosaic_0001>

<bundles_post_ra>
// kernel: tpu_custom_call.1
= control target key start
LH: loop header
LB: loop body
LE: loop exit
PB: predicated region body
PF: predicated region fallthrough
CT: control target
= control target key end

     0   :  { %9 = vsyncpa [#allocation3], 0  ;;  %s527_s0 = inlined_call_operand.hbm [shape: f32[4,8,128], index: 0, kind: input, shape index: {}]   ;;  %s528_s1 = inlined_call_operand.hbm [shape: f32[4,8,128], index: 1, kind: input, shape index: {}]   ;;  %s529_s2 = inlined_call_operand.hbm [shape: f32[8,128], index: 2, kind: output, shape index: {0}]   ;;  %s530_s3 = inlined_call_operand.hbm [shape: f32[1,128], index: 3, kind: output, shape index: {1}]  }
   0x1   :  { %10 = vsyncpa [#allocation6], 0 }
   0x2   :  { %11 = vsyncpa [#allocation4], 0 }
   0x3   :  { %12 = vsyncpa [#allocation9], 0  ;;  %s395_s12 = smov [#allocation2]  }
   0x4   :  { %s18_s13 = sshll.u32 %s395_s12, 4  ;;  %s19_s13 = int_to_ptr.vmem [resolvable:$true] %s18_s13 }
   0x5   :  { %s315_s14 = scalar_lea.vmem %s19_s13, 512  ;;  %p320_p1 = scmp.lt.s32.totalorder %s19_s13, %s19_s13 }
   0x6   :  { %p316_p0 = scmp.ne.s32.totalorder %s19_s13, %s315_s14  ;;  %p321_p2 = scmp.lt.s32.totalorder %s315_s14, %s315_s14 }
   0x8   :  { %p322_p3 = por %p321_p2, %p320_p1 }
   0xa   :  { %p323_p4 = pnand %p322_p3, %p316_p0 }
   0xc   :  { %326 = shalt.err (!%p323_p4)
}
   0xd   :  { %s396_s15 = smov 128   ;;  %s397_s16 = smov 8  }
   0xe   :  { %24 = dma.hbm_to_vmem [thread:$0]  %s527_s0, 512, %s19_s13, [#allocation3], %s396_s15, %s396_s15, %s397_s16  }
   0xf   :  { %s398_s19 = smov [#allocation5]  }
  0x10   :  { %s30_s20 = sshll.u32 %s398_s19, 4  ;;  %s31_s20 = int_to_ptr.vmem [resolvable:$true] %s30_s20 }
  0x11   :  { %s335_s21 = scalar_lea.vmem %s31_s20, 512  ;;  %p340_p6 = scmp.lt.s32.totalorder %s31_s20, %s31_s20 }
  0x12   :  { %p336_p5 = scmp.ne.s32.totalorder %s31_s20, %s335_s21  ;;  %p341_p7 = scmp.lt.s32.totalorder %s335_s21, %s335_s21 }
  0x14   :  { %p342_p8 = por %p341_p7, %p340_p6 }
  0x16   :  { %p343_p9 = pnand %p342_p8, %p336_p5 }
  0x18   :  { %346 = shalt.err (!%p343_p9)
}
  0x19   :  { %36 = dma.hbm_to_vmem [thread:$0]  %s528_s1, 512, %s31_s20, [#allocation6], %s396_s15, %s396_s15, %s397_s16  }
  0x1a   :  { %387 = dma.done.wait [#allocation3], 512  }
  0x1b   :  { %388 = vsyncadd [#allocation3], 4294966784 }
  0x1c   :  { %389 = dma.done.wait [#allocation6], 512  }
  0x1d   :  { %390 = vsyncadd [#allocation6], 4294966784  ;;  %v56_v0 = vld [vmem:[#allocation5 + $0x18] sm:$0xff]  ;;  %v54_v6 = vld [vmem:[#allocation5 + $0x10] sm:$0xff]  ;;  %vm399_vm2 = vmmov 1   ;;  %s401_s0 = smov [#allocation7]  }
  0x1e   :  { %v49_v1 = vld [vmem:[#allocation2 + $0x18] sm:$0xff]  ;;  %289 = vrcp.f32 %v56_v0  ;;  %v47_v10 = vld [vmem:[#allocation2 + $0x10] sm:$0xff]  ;;  %v441_v18 = vld [vmem:[#allocation2] sm:$0xff]  ;;  %v59_v21 = vmul.f32 0.5, %v54_v6  ;;  %v60_v22 = vmul.f32 0.5, %v56_v0  ;;  %v79_v49 = vmul.f32 %v56_v0, %v54_v6  ;;  %s250_s1 = sshll.u32 %s401_s0, 4  ;;  %s251_s1 = int_to_ptr.vmem [resolvable:$true] %s250_s1 }
  0x1f   :  { %291 = vrcp.f32 %v49_v1  ;;  %v57_v17 = vmul.f32 0.5, %v47_v10  ;;  %v58_v19 = vmul.f32 0.5, %v49_v1  ;;  %v443_v20 = vld [vmem:[#allocation2 + $0x8] sm:$0xff]  ;;  %v446_v23 = vld [vmem:[#allocation5] sm:$0xff]  ;;  %v78_v46 = vmul.f32 %v49_v1, %v47_v10  ;;  %s347_s24 = scalar_lea.vmem %s251_s1, 128  ;;  %p352_p11 = scmp.lt.s32.totalorder %s251_s1, %s251_s1 }
  0x20   :  { %v448_v24 = vld [vmem:[#allocation5 + $0x8] sm:$0xff]  ;;  %v65_v30 = vsub.f32 %v446_v23, %v59_v21  ;;  %v66_v31 = vadd.f32 %v59_v21, %v446_v23  ;;  %p348_p10 = scmp.ne.s32.totalorder %s251_s1, %s347_s24  ;;  %p353_p12 = scmp.lt.s32.totalorder %s347_s24, %s347_s24 }
  0x21   :  { %v452_v26 = vsub.f32 %v441_v18, %v57_v17  ;;  %v455_v27 = vadd.f32 %v57_v17, %v441_v18  ;;  %v458_v28 = vsub.f32 %v443_v20, %v58_v19  ;;  %v461_v29 = vadd.f32 %v58_v19, %v443_v20 }
  0x22   :  { %v67_v32 = vsub.f32 %v448_v24, %v60_v22  ;;  %v68_v33 = vadd.f32 %v60_v22, %v448_v24  ;;  %p354_p13 = por %p353_p12, %p352_p11 }
  0x23   :  { %v69_v34 = vmin.f32 %v455_v27, %v66_v31  ;;  %v70_v35 = vmax.f32 %v452_v26, %v65_v30 }
  0x24   :  { %v73_v36 = vmin.f32 %v461_v29, %v68_v33  ;;  %v74_v37 = vmax.f32 %v458_v28, %v67_v32  ;;  %v90_v17 = vmin.f32 %v458_v28, %v67_v32  ;;  %p355_p0 = pnand %p354_p13, %p348_p10 }
  0x25   :  { %v71_v41 = vsub.f32 %v69_v34, %v70_v35 }
  0x26   :  { %v75_v42 = vsub.f32 %v73_v36, %v74_v37  ;;  %v400_v36 = vmov 0.0  }
  0x27   :  { %v72_v53 = vmax.f32 %v71_v41, 0.0 }
  0x28   :  { %v76_v54 = vmax.f32 %v75_v42, 0.0 }
  0x2b   :  { %v290_v2 = vpop.eup %289 }
  0x2c   :  { %v104_v3 = vmul.f32 %v290_v2, %v56_v0  ;;  %v292_v4 = vpop.eup %291  ;;  %v77_v0 = vmul.f32 %v76_v54, %v72_v53 }
  0x2d   :  { %v147_v7 = vmul.f32 %v292_v4, %v49_v1  ;;  %v80_v1 = vadd.f32 %v79_v49, %v78_v46 }
  0x2e   :  { %v105_v5 = vsub.f32 2.0, %v104_v3 }
  0x2f   :  { %v148_v9 = vsub.f32 2.0, %v147_v7  ;;  %v85_v7 = vmax.f32 %v455_v27, %v66_v31 }
  0x30   :  { %v106_v8 = vmul.f32 %v290_v2, %v105_v5 }
  0x31   :  { %v149_v12 = vmul.f32 %v292_v4, %v148_v9 }
  0x32   :  { %v429_v11 = vmul.f32 %v106_v8, %v54_v6 }
  0x33   :  { %v434_v14 = vmul.f32 %v149_v12, %v47_v10  ;;  %v81_v10 = vsub.f32 %v80_v1, %v77_v0  ;;  %v86_v12 = vmin.f32 %v452_v26, %v65_v30 }
  0x34   :  { %v432_v13 = vand.u32 2147483647, %v429_v11 }
  0x35   :  { %v439_v16 = vand.u32 2147483647, %v434_v14  ;;  %v82_v27 = vadd.f32 1e-07, %v81_v10  ;;  %v87_v31 = vsub.f32 %v85_v7, %v86_v12 }
  0x36   :  { %293 = vrcp.f32 %v432_v13  ;;  %v124_v15 = vadd.f32 1.0, %v432_v13  ;;  %vm112_vm0 = vcmp.gt.f32.partialorder %v432_v13, 2.4142137  ;;  %vm113_vm1 = vcmp.gt.f32.partialorder %v432_v13, 0.41421357 }
  0x37   :  { %v167_v25 = vadd.f32 1.0, %v439_v16  ;;  %vm114_vm3 = vmxor %vm112_vm0, %vm399_vm2  ;;  %v274_v50 = vadd.f32 -1.0, %v432_v13  ;;  %vm155_vm4 = vcmp.gt.f32.partialorder %v439_v16, 2.4142137  ;;  %vm156_vm6 = vcmp.gt.f32.partialorder %v439_v16, 0.41421357 }
  0x38   :  { %295 = vrcp.f32 %v124_v15  ;;  %vm480_vm5 = vmand %vm113_vm1, %vm114_vm3  ;;  %v277_v62 = vadd.f32 -1.0, %v439_v16 }
  0x39   :  { %297 = vrcp.f32 %v439_v16  ;;  %vm157_vm7 = vmxor %vm155_vm4, %vm399_vm2  ;;  %v116_v26 = vsel %vm480_vm5, 0.7853982, %v400_v36 }
  0x3a   :  { %299 = vrcp.f32 %v167_v25  ;;  %vm494_vm8 = vmand %vm156_vm6, %vm157_vm7 }
  0x3b   :  { %301 = vrcp.f32 %v82_v27  ;;  %v159_v41 = vsel %vm494_vm8, 0.7853982, %v400_v36 }
  0x43   :  { %v294_v38 = vpop.eup %293 }
  0x44   :  { %v119_v39 = vmul.f32 %v294_v38, %v432_v13 }
  0x45   :  { %v296_v40 = vpop.eup %295 }
  0x46   :  { %v120_v43 = vsub.f32 2.0, %v119_v39  ;;  %v298_v44 = vpop.eup %297  ;;  %v126_v45 = vmul.f32 %v296_v40, %v124_v15  ;;  %v89_v15 = vmax.f32 %v461_v29, %v68_v33  ;;  %v88_v33 = vmax.f32 %v87_v31, 0.0 }
  0x47   :  { %v162_v48 = vmul.f32 %v298_v44, %v439_v16  ;;  %v300_v52 = vpop.eup %299 }
  0x48   :  { %v121_v47 = vmul.f32 %v294_v38, %v120_v43  ;;  %v127_v51 = vsub.f32 2.0, %v126_v45  ;;  %v169_v57 = vmul.f32 %v300_v52, %v167_v25  ;;  %v91_v35 = vsub.f32 %v89_v15, %v90_v17 }
  0x49   :  { %v163_v55 = vsub.f32 2.0, %v162_v48  ;;  %v117_v38 = vsel %vm112_vm0, 1.5707964, %v116_v26  ;;  %v93_v46 = vmul.f32 %v88_v33, %v88_v33 }
  0x4a   :  { %v128_v56 = vmul.f32 %v296_v40, %v127_v51  ;;  %v122_v59 = vsub.f32 0.0, %v121_v47  ;;  %v170_v63 = vsub.f32 2.0, %v169_v57  ;;  %v92_v37 = vmax.f32 %v91_v35, 0.0 }
  0x4b   :  { %v164_v60 = vmul.f32 %v298_v44, %v163_v55  ;;  %v160_v47 = vsel %vm155_vm4, 1.5707964, %v159_v41 }
  0x4c   :  { %v129_v61 = vmul.f32 %v274_v50, %v128_v56  ;;  %v171_v3 = vmul.f32 %v300_v52, %v170_v63  ;;  %v94_v48 = vmul.f32 %v92_v37, %v92_v37  ;;  %v152_v56 = vand.u32 2147483648, %v434_v14 }
  0x4d   :  { %v165_v6 = vsub.f32 0.0, %v164_v60  ;;  %v302_v60 = vpop.eup %301  ;;  %v98_v14 = vsub.f32 %v448_v24, %v443_v20 }
  0x4e   :  { %v130_v2 = vsel %vm480_vm5, %v129_v61, %v432_v13  ;;  %v172_v9 = vmul.f32 %v277_v62, %v171_v3  ;;  %v109_v13 = vand.u32 2147483648, %v429_v11  ;;  %v95_v55 = vadd.f32 %v94_v48, %v93_v46 }
  0x4f   :  { %v131_v4 = vsel %vm112_vm0, %v122_v59, %v130_v2  ;;  %v84_v63 = vmul.f32 %v302_v60, %v77_v0  ;;  %v97_v11 = vsub.f32 %v446_v23, %v441_v18  ;;  %v100_v7 = vmul.f32 %v98_v14, %v98_v14 }
  0x50   :  { %v132_v8 = vmul.f32 %v131_v4, %v131_v4  ;;  %v173_v21 = vsel %vm494_vm8, %v172_v9, %v439_v16  ;;  %v139_v44 = vadd.f32 %v131_v4, %v117_v38  ;;  %v96_v61 = vadd.f32 1e-07, %v95_v55 }
  0x51   :  { %v174_v22 = vsel %vm155_vm4, %v165_v6, %v173_v21  ;;  %v99_v6 = vmul.f32 %v97_v11, %v97_v11  ;;  %v227_v0 = vlaneseq }
  0x52   :  { %v133_v19 = vmul.f32 0.080537446, %v132_v8  ;;  %v175_v34 = vmul.f32 %v174_v22, %v174_v22  ;;  %v140_v40 = vmul.f32 %v132_v8, %v131_v4  ;;  %v182_v54 = vadd.f32 %v174_v22, %v160_v47 }
  0x53   :  { %303 = vrcp.f32 %v96_v61  ;;  %v101_v9 = vadd.f32 %v100_v7, %v99_v6  ;;  %v233_v23 = vand.u32 127, %v227_v0 }
  0x54   :  { %v275_v25 = vadd.f32 -0.13877685, %v133_v19  ;;  %v176_v30 = vmul.f32 0.080537446, %v175_v34  ;;  %v183_v51 = vmul.f32 %v175_v34, %v174_v22  ;;  %v228_v22 = vshrl.u32 %v227_v0, 7 }
  0x55   :  { %v102_v17 = vmul.f32 0.25, %v101_v9 }
  0x56   :  { %v135_v29 = vmul.f32 %v275_v25, %v132_v8  ;;  %v278_v32 = vadd.f32 -0.13877685, %v176_v30  ;;  %v229_v18 = vmul.u32 128, %v228_v22 }
  0x58   :  { %v136_v28 = vadd.f32 0.19977711, %v135_v29  ;;  %v178_v42 = vmul.f32 %v278_v32, %v175_v34  ;;  %v234_v24 = vadd.s32 %v233_v23, %v229_v18 }
  0x5a   :  { %v137_v39 = vmul.f32 %v136_v28, %v132_v8  ;;  %v179_v45 = vadd.f32 0.19977711, %v178_v42  ;;  %vm235_vm9 = vcmp.lt.s32.totalorder %v234_v24, 16 }
  0x5c   :  { %v276_v43 = vadd.f32 -0.3333295, %v137_v39  ;;  %v180_v50 = vmul.f32 %v179_v45, %v175_v34 }
  0x5e   :  { %v141_v49 = vmul.f32 %v276_v43, %v140_v40  ;;  %v279_v53 = vadd.f32 -0.3333295, %v180_v50 }
  0x60   :  { %v142_v52 = vadd.f32 %v141_v49, %v139_v44  ;;  %v184_v57 = vmul.f32 %v279_v53, %v183_v51  ;;  %v304_v5 = vpop.eup %303 }
  0x61   :  { %v200_v8 = vmul.f32 %v304_v5, %v96_v61 }
  0x62   :  { %v144_v58 = vor.u32 %v142_v52, %v109_v13  ;;  %v185_v59 = vadd.f32 %v184_v57, %v182_v54 }
  0x63   :  { %v201_v10 = vsub.f32 2.0, %v200_v8 }
  0x64   :  { %v187_v62 = vor.u32 %v185_v59, %v152_v56 }
  0x65   :  { %v202_v21 = vmul.f32 %v304_v5, %v201_v10 }
  0x66   :  { %v189_v16 = vsub.f32 %v144_v58, %v187_v62 }
  0x67   :  { %v203_v27 = vmul.f32 %v202_v21, %v102_v17 }
  0x68   :  { %v190_v1 = vmul.f32 0.40528473, %v189_v16 }
  0x6a   :  { %v191_v2 = vmul.f32 %v190_v1, %v189_v16 }
  0x6c   :  { %v192_v3 = vsub.f32 %v191_v2, %v84_v63 }
  0x6e   :  { %v193_v4 = vadd.f32 1.0000001, %v192_v3 }
  0x70   :  { %305 = vrcp.f32 %v193_v4 }
  0x7d   :  { %v306_v12 = vpop.eup %305 }
  0x7e   :  { %v195_v15 = vmul.f32 %v306_v12, %v193_v4 }
  0x80   :  { %v196_v19 = vsub.f32 2.0, %v195_v15 }
  0x82   :  { %v197_v25 = vmul.f32 %v306_v12, %v196_v19 }
  0x84   :  { %v198_v34 = vmul.f32 %v197_v25, %v191_v2 }
  0x86   :  { %v204_v31 = vmul.f32 %v198_v34, %v191_v2 }
  0x88   :  { %v205_v20 = vadd.f32 %v204_v31, %v203_v27 }
  0x8a   :  { %v206_v35 = vsub.f32 %v84_v63, %v205_v20 }
  0x8c   :  { %v280_v36 = vclamps-f32 %v206_v35, 1.0 }
  0x8e   :  { %209 = vst [vmem:[#allocation7] sm:$0xff] %v280_v36  ;;  %v210_v26 = vsub.f32 1.0, %v280_v36 }
  0x8f   :  { %358 = shalt.err (!%p355_p0)
}
  0x90   :  { %253 = dma.vmem_to_hbm [thread:$0]  %s251_s1, 128, %s529_s2, [#allocation4]   ;;  %v236_v29 = vsel %vm235_vm9, %v210_v26, 0.0 }
  0x91   :  { %v237_v30 = vrot.slane %v236_v29, 4  ;;  %s402_s27 = smov [#allocation8]  }
  0x92   :  { %s260_s28 = sshll.u32 %s402_s27, 4  ;;  %s261_s28 = int_to_ptr.vmem [resolvable:$true] %s260_s28 }
  0x93   :  { %v238_v28 = vadd.f32 %v237_v30, %v236_v29  ;;  %s367_s29 = scalar_lea.vmem %s261_s28, 16  ;;  %s371_s30 = scalar_lea.vmem %s261_s28, 32 }
  0x94   :  { %p368_p1 = scmp.ne.s32.totalorder %s261_s28, %s367_s29  ;;  %p372_p2 = scmp.lt.s32.totalorder %s261_s28, %s261_s28 }
  0x95   :  { %v239_v32 = vrot.slane %v238_v28, 2  ;;  %p373_p3 = scmp.lt.s32.totalorder %s371_s30, %s367_s29 }
  0x97   :  { %v240_v33 = vadd.f32 %v239_v32, %v238_v28  ;;  %p374_p4 = por %p373_p3, %p372_p2 }
  0x99   :  { %v241_v37 = vrot.slane %v240_v33, 1  ;;  %p375_p5 = pnand %p374_p4, %p368_p1 }
  0x9b   :  { %v242_v38 = vadd.f32 %v241_v37, %v240_v33 }
  0x9d   :  { %243 = vst [vmem:[#allocation8] sm:$0x1] %v242_v38 }
  0x9e   :  { %378 = shalt.err (!%p375_p5)
}
  0x9f   :  { %263 = dma.vmem_to_hbm [thread:$0]  %s261_s28, 16, %s530_s3, [#allocation9]  }
  0xa0   :  { %391 = dma.done.wait [#allocation4], 128  }
  0xa1   :  { %392 = vsyncadd [#allocation4], 4294967168 }
  0xa2   :  { %393 = dma.done.wait [#allocation9], 16  }
  0xa3   :  { %394 = vsyncadd [#allocation9], 4294967280 }
  0xa4   :  { %270 = vsyncpa [#allocation3], 1 }
  0xa5   :  { %271 = vsyncpa [#allocation6], 1 }
  0xa6   :  { %272 = vsyncpa [#allocation4], 1 }
  0xa7   :  { %273 = vsyncpa [#allocation9], 1 }

</bundles_post_ra>
